<compile_context>
chip_gen: v5e
topology: v5e:2x2
jax: 0.10.0
libtpu: 0.0.40
codegen_flags: <defaults>
</compile_context>

<pallas_src>
import jax
import jax.numpy as jnp
from jax.experimental import pallas as pl
from jax.experimental.pallas import tpu as pltpu


def _cdiv(a: int, b: int) -> int:
    return -(-a // b)


def _round_up(a: int, b: int) -> int:
    return _cdiv(a, b) * b


def _pe_kernel(sin_c_ref, cos_c_ref, sin_f_ref, cos_f_ref, o_ref):
    # sin_c/cos_c: (1, d_pad) coarse rows for this tile (A = start*w + phase).
    # sin_f/cos_f: (tile_len, d_pad) fine tables (B = r*w), resident across the grid.
    # o_ref:       (tile_len, d_pad) output block.
    # sin(A + B) = sin(A)cos(B) + cos(A)sin(B); (1, d) rows broadcast implicitly.
    o_ref[...] = (sin_c_ref[...] * cos_f_ref[...]
                  + cos_c_ref[...] * sin_f_ref[...]).astype(o_ref.dtype)


def _pick_tile_len(max_seq_length: int, d_pad: int, itemsize: int) -> int:
    """~1 MiB output tiles, sublane-aligned rows, preferring an even grid step count."""
    align = max(8, 32 // itemsize)                    # 8 rows for f32, 16 for bf16
    row_bytes = d_pad * itemsize
    target_rows = max(align, ((1 << 20) // max(1, row_bytes)) // align * align)
    tile = min(target_rows, _round_up(max_seq_length, align))
    # Prefer an even number of grid steps so "parallel" can use both v7x TensorCores.
    n = _cdiv(max_seq_length, tile)
    if n > 1 and n % 2 == 1:
        tile2 = _round_up(_cdiv(max_seq_length, n + 1), align)
        if tile2 >= align and _cdiv(max_seq_length, tile2) % 2 == 0:
            tile = tile2
    return tile


def positional_encoding(d_model: int, max_seq_length: int, *,
                        tile_len: int | None = None, dtype=jnp.float32):
    """Returns the (max_seq_length, d_model) positional-encoding table."""
    # float32 positions lose exact integer representation above 2^24.
    assert max_seq_length < (1 << 24), "max_seq_length too large for f32 positions"

    itemsize = jnp.dtype(dtype).itemsize
    d_pad = _round_up(d_model, 128)                   # lane-dense output columns
    if tile_len is None:
        tile_len = _pick_tile_len(max_seq_length, d_pad, itemsize)
    align = max(8, 32 // itemsize)
    tile_len = _round_up(max(tile_len, align), align)

    num_tiles = _cdiv(max_seq_length, tile_len)
    seq_pad = num_tiles * tile_len                    # rows padded; sliced after the call

    # Column-only quantities (f32). Padded columns get w=0, phase=0 -> output 0 (sliced off).
    j = jnp.arange(d_pad)
    k = (j // 2).astype(jnp.float32)
    w = jnp.power(jnp.float32(10000.0), -(2.0 * k) / jnp.float32(d_model))
    w = jnp.where(j < d_model, w, 0.0)                                  # (d_pad,)
    phase = jnp.where(j < d_model,
                      (j % 2).astype(jnp.float32) * jnp.float32(jnp.pi / 2),
                      0.0)                                              # (d_pad,)

    # Fine tables: B = r*w for r in [0, tile_len) -- computed once, resident in VMEM.
    r = jnp.arange(tile_len, dtype=jnp.float32).reshape(tile_len, 1)
    fine = r * w                                                        # (tile_len, d_pad)
    sin_f = jnp.sin(fine)
    cos_f = jnp.cos(fine)

    # Coarse rows: A = start*w + phase for each tile start -- one (1, d_pad) row per grid step.
    starts = (jnp.arange(num_tiles, dtype=jnp.float32) * jnp.float32(tile_len)).reshape(num_tiles, 1)
    coarse = starts * w + phase                                         # (num_tiles, d_pad)
    sin_c = jnp.sin(coarse)
    cos_c = jnp.cos(coarse)

    pe_padded = pl.pallas_call(
        _pe_kernel,
        out_shape=jax.ShapeDtypeStruct((seq_pad, d_pad), dtype),
        grid_spec=pltpu.PrefetchScalarGridSpec(
            num_scalar_prefetch=0,
            grid=(num_tiles,),
            in_specs=[
                pl.BlockSpec((1, d_pad), lambda i: (i, 0)),         # sin(A) per tile
                pl.BlockSpec((1, d_pad), lambda i: (i, 0)),         # cos(A) per tile
                pl.BlockSpec((tile_len, d_pad), lambda i: (0, 0)),  # sin(B) resident
                pl.BlockSpec((tile_len, d_pad), lambda i: (0, 0)),  # cos(B) resident
            ],
            out_specs=pl.BlockSpec((tile_len, d_pad), lambda i: (i, 0)),
        ),
        compiler_params=pltpu.CompilerParams(dimension_semantics=("parallel",)),
    )(sin_c, cos_c, sin_f, cos_f)

    return pe_padded[:max_seq_length, :d_model]


def _reference(d_model: int, max_seq_length: int):
    even_i = jnp.arange(0, d_model, 2, dtype=jnp.float32)
    denominator = jnp.power(jnp.float32(10000.0), even_i / d_model)
    position = jnp.arange(max_seq_length, dtype=jnp.float32).reshape(max_seq_length, 1)
    even_pe = jnp.sin(position / denominator)
    odd_pe = jnp.cos(position / denominator)
    return jnp.stack([even_pe, odd_pe], axis=2).reshape(max_seq_length, d_model)


if __name__ == "__main__":
    # The module's forward() takes no tensor inputs; shapes come from __init__.
    d_model = 32
    max_seq_length = 8

    # PRNGKey kept for convention (no random inputs are actually needed).
    _ = jax.random.PRNGKey(0)

    pe = positional_encoding(d_model, max_seq_length)
    pe = jax.block_until_ready(pe)

    ref = _reference(d_model, max_seq_length)
    assert pe.shape == (max_seq_length, d_model)
    assert pe.dtype == jnp.float32
    assert jnp.allclose(pe, ref, atol=1e-5, rtol=1e-5), "mismatch vs reference"

    print("KERNEL_OK")
</pallas_src>

<mosaic_0001>
module attributes {stable_mosaic.version = 11 : i64} {
  func.func @_pe_kernel(%arg0: i32, %arg1: memref<1x128xf32, #tpu.memory_space<vmem>>, %arg2: memref<1x128xf32, #tpu.memory_space<vmem>>, %arg3: memref<8x128xf32, #tpu.memory_space<vmem>>, %arg4: memref<8x128xf32, #tpu.memory_space<vmem>>, %arg5: memref<8x128xf32, #tpu.memory_space<vmem>>) attributes {dimension_semantics = [#tpu.dimension_semantics<parallel>], iteration_bounds = array<i64: 1>, scalar_prefetch = 0 : i64, scratch_operands = 0 : i64, tpu.core_type = #tpu.core_type<tc>, window_params = [{transform_indices = @transform_0, window_bounds = array<i64: 1, 128>}, {transform_indices = @transform_1, window_bounds = array<i64: 1, 128>}, {pipeline_mode = #tpu.pipeline_mode<synchronous>, transform_indices = @transform_2, window_bounds = array<i64: 8, 128>}, {pipeline_mode = #tpu.pipeline_mode<synchronous>, transform_indices = @transform_3, window_bounds = array<i64: 8, 128>}, {transform_indices = @transform_4, window_bounds = array<i64: 8, 128>}]} {
    %c0 = arith.constant 0 : index
    %c0_0 = arith.constant 0 : index
    %0 = vector.load %arg1[%c0, %c0_0] : memref<1x128xf32, #tpu.memory_space<vmem>>, vector<1x128xf32>
    %c0_1 = arith.constant 0 : index
    %c0_2 = arith.constant 0 : index
    %1 = vector.load %arg4[%c0_1, %c0_2] : memref<8x128xf32, #tpu.memory_space<vmem>>, vector<8x128xf32>
    %2 = vector.broadcast %0 : vector<1x128xf32> to vector<8x128xf32>
    %3 = arith.mulf %2, %1 : vector<8x128xf32>
    %c0_3 = arith.constant 0 : index
    %c0_4 = arith.constant 0 : index
    %4 = vector.load %arg2[%c0_3, %c0_4] : memref<1x128xf32, #tpu.memory_space<vmem>>, vector<1x128xf32>
    %c0_5 = arith.constant 0 : index
    %c0_6 = arith.constant 0 : index
    %5 = vector.load %arg3[%c0_5, %c0_6] : memref<8x128xf32, #tpu.memory_space<vmem>>, vector<8x128xf32>
    %6 = vector.broadcast %4 : vector<1x128xf32> to vector<8x128xf32>
    %7 = arith.mulf %6, %5 : vector<8x128xf32>
    %8 = arith.addf %3, %7 : vector<8x128xf32>
    %c0_7 = arith.constant 0 : index
    %c0_8 = arith.constant 0 : index
    %9 = vector.load %arg5[%c0_7, %c0_8] : memref<8x128xf32, #tpu.memory_space<vmem>>, vector<8x128xf32>
    tpu.vector_store %arg5[%c0_7, %c0_8], %8 {strides = array<i32>} : memref<8x128xf32, #tpu.memory_space<vmem>>, vector<8x128xf32>,
    return
  }
  func.func @transform_0(%arg0: i32) -> (i32, i32) {
    %c0_i32 = arith.constant 0 : i32
    %c0_i32_0 = arith.constant 0 : i32
    return %arg0, %c0_i32 : i32, i32
  }
  func.func @transform_1(%arg0: i32) -> (i32, i32) {
    %c0_i32 = arith.constant 0 : i32
    %c0_i32_0 = arith.constant 0 : i32
    return %arg0, %c0_i32 : i32, i32
  }
  func.func @transform_2(%arg0: i32) -> (i32, i32) {
    %c0_i32 = arith.constant 0 : i32
    %c0_i32_0 = arith.constant 0 : i32
    %c0_i32_1 = arith.constant 0 : i32
    return %c0_i32, %c0_i32_0 : i32, i32
  }
  func.func @transform_3(%arg0: i32) -> (i32, i32) {
    %c0_i32 = arith.constant 0 : i32
    %c0_i32_0 = arith.constant 0 : i32
    %c0_i32_1 = arith.constant 0 : i32
    return %c0_i32, %c0_i32_0 : i32, i32
  }
  func.func @transform_4(%arg0: i32) -> (i32, i32) {
    %c0_i32 = arith.constant 0 : i32
    %c0_i32_0 = arith.constant 0 : i32
    return %arg0, %c0_i32 : i32, i32
  }
}

</mosaic_0001>

<bundles_post_ra>
// kernel: tpu_custom_call.1
= control target key start
LH: loop header
LB: loop body
LE: loop exit
PB: predicated region body
PF: predicated region fallthrough
CT: control target
= control target key end

     0   :  { %9 = vsyncpa [#allocation3], 0  ;;  %s286_s0 = inlined_call_operand.hbm [shape: f32[1,128], index: 0, kind: input, shape index: {}]   ;;  %s287_s1 = inlined_call_operand.hbm [shape: f32[1,128], index: 1, kind: input, shape index: {}]   ;;  %s288_s2 = inlined_call_operand.hbm [shape: f32[8,128], index: 2, kind: input, shape index: {}]   ;;  %s289_s3 = inlined_call_operand.hbm [shape: f32[8,128], index: 3, kind: input, shape index: {}]   ;;  %s290_s4 = inlined_call_operand.hbm [shape: f32[8,128], index: 4, kind: output, shape index: {}]  }
   0x1   :  { %10 = vsyncpa [#allocation6], 0 }
   0x2   :  { %11 = vsyncpa [#allocation9], 0  ;;  %s29_s17 = sshll.u32 %s287_s1, 4  ;;  %s30_s17 = int_to_ptr.hbm [resolvable:$true] %s29_s17 }
   0x3   :  { %12 = vsyncpa [#allocation4], 0  ;;  %s241_s18 = smov [#allocation5]   ;;  %s18_s22 = sshll.u32 %s286_s0, 4  ;;  %s19_s22 = int_to_ptr.hbm [resolvable:$true] %s18_s22 }
   0x4   :  { %s31_s19 = sshll.u32 %s241_s18, 4  ;;  %s242_s23 = smov [#allocation2]   ;;  %s32_s19 = int_to_ptr.vmem [resolvable:$true] %s31_s19 }
   0x5   :  { %34 = dma.hbm_to_vmem [thread:$0]  %s30_s17, 16, %s32_s19, [#allocation6]  }
   0x6   :  { %s20_s24 = sshll.u32 %s242_s23, 4  ;;  %s40_s27 = sshll.u32 %s288_s2, 4  ;;  %s21_s24 = int_to_ptr.vmem [resolvable:$true] %s20_s24  ;;  %s41_s27 = int_to_ptr.hbm [resolvable:$true] %s40_s27 }
   0x7   :  { %23 = dma.hbm_to_vmem [thread:$0]  %s19_s22, 16, %s21_s24, [#allocation3]  }
   0x8   :  { %s51_s29 = sshll.u32 %s289_s3, 4  ;;  %s243_s30 = smov [#allocation7]   ;;  %s52_s29 = int_to_ptr.hbm [resolvable:$true] %s51_s29 }
   0x9   :  { %s42_s5 = sshll.u32 %s243_s30, 4  ;;  %s244_s0 = smov [#allocation8]   ;;  %s43_s5 = int_to_ptr.vmem [resolvable:$true] %s42_s5 }
   0xa   :  { %45 = dma.hbm_to_vmem [thread:$0]  %s41_s27, 128, %s43_s5, [#allocation6]  }
   0xb   :  { %s53_s6 = sshll.u32 %s244_s0, 4  ;;  %s54_s6 = int_to_ptr.vmem [resolvable:$true] %s53_s6 }
   0xc   :  { %56 = dma.hbm_to_vmem [thread:$0]  %s52_s29, 128, %s54_s6, [#allocation9]  }
   0xd   :  { %233 = dma.done.wait [#allocation3], 16  }
   0xe   :  { %234 = vsyncadd [#allocation3], 4294967280 }
   0xf   :  { %235 = dma.done.wait [#allocation6], 144  }
  0x10   :  { %236 = vsyncadd [#allocation6], 4294967152 }
  0x11   :  { %237 = dma.done.wait [#allocation9], 128  }
  0x12   :  { %238 = vsyncadd [#allocation9], 4294967168  ;;  %v74_v0 = vld [vmem:[#allocation8] sm:$0xff]  ;;  %v111_v1 = vld [vmem:[#allocation2] ss:$0 sm:$0xff]  ;;  %s245_s2 = smov [#allocation10]  }
  0x13   :  { %v80_v2 = vld [vmem:[#allocation7] sm:$0xff]  ;;  %v112_v3 = vld [vmem:[#allocation5] ss:$0 sm:$0xff]  ;;  %v78_v4 = vmul.f32 %v111_v1, %v74_v0  ;;  %s92_s3 = sshll.u32 %s245_s2, 4  ;;  %s94_s9 = sshll.u32 %s290_s4, 4  ;;  %s93_s3 = int_to_ptr.vmem [resolvable:$true] %s92_s3  ;;  %s95_s9 = int_to_ptr.hbm [resolvable:$true] %s94_s9 }
  0x14   :  { %v84_v5 = vmul.f32 %v112_v3, %v80_v2 }
  0x16   :  { %v85_v6 = vadd.f32 %v84_v5, %v78_v4 }
  0x18   :  { %86 = vst [vmem:[#allocation10] sm:$0xff] %v85_v6 }
  0x19   :  { %97 = dma.vmem_to_hbm [thread:$0]  %s93_s3, 128, %s95_s9, [#allocation4]  }
  0x1a   :  { %239 = dma.done.wait [#allocation4], 128  }
  0x1b   :  { %240 = vsyncadd [#allocation4], 4294967168 }
  0x1c   :  { %102 = vsyncpa [#allocation3], 1 }
  0x1d   :  { %103 = vsyncpa [#allocation6], 1 }
  0x1e   :  { %104 = vsyncpa [#allocation9], 1 }
  0x1f   :  { %105 = vsyncpa [#allocation4], 1 }

</bundles_post_ra>
